<compile_context>
chip_gen: v7x
topology: tpu7x:2x2x1
jax: 0.10.0
libtpu: 0.0.40
codegen_flags: <defaults>
</compile_context>

<pallas_src>
import functools

import jax
import jax.numpy as jnp
import numpy as np
from jax.experimental import pallas as pl
from jax.experimental.pallas import tpu as pltpu


def _round_up(n, m):
    return (n + m - 1) // m * m


def bilstm_fc_kernel(x_ref, p_ref, out_ref, *, T, Bp, I_pad, H, O_pad,
                     r_wx, r_whh, r_fcw, r_b, r_fcb):
    """Single-program bi-LSTM(last step) + Linear.

    Gate order in the packed weights is (i, f, o, g); the i/f/o columns are
    pre-scaled by 0.5 so sigmoid(x) == 0.5*tanh(gate)+0.5.
    """
    G = 4 * H
    x = x_ref[...]                                    # (T*Bp, I_pad)

    # Static slices into the fused parameter slab (free in VMEM).
    W_x = p_ref[r_wx:r_wx + I_pad, :]                 # (I_pad, 8H)  [w_ih_f | w_ih_b]
    b_all = p_ref[r_b:r_b + 1, :]                     # (1, 8H)      [b_f | b_b]
    whh = p_ref[r_whh:r_whh + H, 0:G]                 # (H, 4H)
    fcw = p_ref[r_fcw:r_fcw + 2 * H, 0:O_pad]         # (2H, O_pad)
    fcb = p_ref[r_fcb:r_fcb + 1, 0:O_pad]             # (1, O_pad)

    # Hoisted input projection for BOTH directions (+ fused biases): no serial
    # dependency on h/c, so it stays off the recurrent critical path.
    gx_all = jnp.dot(x, W_x, preferred_element_type=jnp.float32) + b_all   # (T*Bp, 8H)

    def gate_combine(gates, c):
        # One EUP pass (tanh) over all 4H lanes; i/f/o were pre-scaled by 0.5.
        t = jnp.tanh(gates)
        sig = 0.5 * t[:, :3 * H] + 0.5                # == sigmoid of pre-activation
        g = t[:, 3 * H:]
        i = sig[:, 0 * H:1 * H]
        f = sig[:, 1 * H:2 * H]
        o = sig[:, 2 * H:3 * H]
        c_new = f * c + i * g
        h_new = o * jnp.tanh(c_new)
        return h_new, c_new

    # Forward recurrence, fully unrolled (T static & small).
    # TODO(synk): whh could be kept resident in the MXU across the T steps via
    # pltpu.matmul_push_rhs / matmul_acc_lhs / matmul_pop; kept as jnp.dot for
    # lowering robustness at these tiny shapes.
    h = jnp.zeros((Bp, H), jnp.float32)
    c = jnp.zeros((Bp, H), jnp.float32)
    for step in range(T):
        gates = gx_all[step * Bp:(step + 1) * Bp, 0:G] + jnp.dot(
            h, whh, preferred_element_type=jnp.float32)
        h, c = gate_combine(gates, c)
    h_fwd = h

    # Backward direction: the head only consumes out[:, -1, :]; for the reverse
    # direction that is exactly its FIRST step (x[T-1] from the zero state), so
    # h0 = c0 = 0 and w_hh_b contributes nothing.
    # NOTE: only valid while the head reads out[:, -1, :] with zero init state.
    gates_b = gx_all[(T - 1) * Bp:T * Bp, G:2 * G]
    h_bwd, _ = gate_combine(gates_b, jnp.zeros((Bp, H), jnp.float32))

    # Dropout(p=0.5) is identity in eval mode.
    # TODO(synk): training-mode dropout (Bernoulli mask via pltpu.prng_*) not emitted.
    # FC head as explicit accumulate (MRB-friendly on v7x), no lane-axis concat.
    acc = jnp.dot(h_fwd, fcw[0:H, :], preferred_element_type=jnp.float32)
    acc = acc + jnp.dot(h_bwd, fcw[H:2 * H, :], preferred_element_type=jnp.float32)
    out_ref[...] = acc + fcb


def make_rnn_forward(params, input_size):
    """Pre-pack parameters ONCE into a single VMEM slab and return a jitted
    forward(x) that only does x prep + one pallas_call."""
    H = params["w_hh_f"].shape[1]
    O = params["fc_w"].shape[0]
    I = input_size
    I_pad = _round_up(I, 8)
    O_pad = _round_up(O, 128)
    G = 4 * H
    W_slab = 2 * G                       # 8H lanes; holds [fwd | bwd] gate columns
    assert O_pad <= W_slab, "fc output wider than slab; widen W_slab"

    def reorder(a):
        # PyTorch gate order (i, f, g, o) -> kernel order (i, f, o, g).
        return jnp.concatenate(
            [a[..., :2 * H], a[..., 3 * H:4 * H], a[..., 2 * H:3 * H]], axis=-1)

    def prescale(a):
        # Scale i/f/o columns by 0.5 for the sigmoid-via-tanh identity.
        return jnp.concatenate([0.5 * a[..., :3 * H], a[..., 3 * H:]], axis=-1)

    f32 = jnp.float32
    wih_f = prescale(reorder(params["w_ih_f"].T.astype(f32)))       # (I, 4H)
    wib = prescale(reorder(params["w_ih_b"].T.astype(f32)))         # (I, 4H)
    whh_f = prescale(reorder(params["w_hh_f"].T.astype(f32)))       # (H, 4H)
    b_f = prescale(reorder((params["b_ih_f"] + params["b_hh_f"])[None, :].astype(f32)))
    b_b = prescale(reorder((params["b_ih_b"] + params["b_hh_b"])[None, :].astype(f32)))

    W_x = jnp.pad(jnp.concatenate([wih_f, wib], axis=1),
                  ((0, I_pad - I), (0, 0)))                          # (I_pad, 8H)
    whh_p = jnp.pad(whh_f, ((0, 0), (0, W_slab - G)))                # (H, 8H)
    fcw_p = jnp.pad(params["fc_w"].T.astype(f32),
                    ((0, 0), (0, W_slab - O)))                       # (2H, 8H)
    b_all = jnp.concatenate([b_f, b_b], axis=1)                      # (1, 8H)
    fcb_p = jnp.pad(params["fc_b"][None, :].astype(f32),
                    ((0, 0), (0, W_slab - O)))                       # (1, 8H)

    # Row layout (all weight blocks start on 8-aligned sublane offsets).
    r_wx = 0
    r_whh = r_wx + I_pad
    r_fcw = r_whh + H
    r_b = r_fcw + 2 * H
    r_fcb = r_b + 1
    n_rows = _round_up(r_fcb + 1, 8)
    slab = jnp.concatenate(
        [W_x, whh_p, fcw_p, b_all, fcb_p,
         jnp.zeros((n_rows - (r_fcb + 1), W_slab), f32)], axis=0)    # (n_rows, 8H)
    slab = jax.device_put(slab)

    kernel_meta = dict(I_pad=I_pad, H=H, O_pad=O_pad,
                       r_wx=r_wx, r_whh=r_whh, r_fcw=r_fcw, r_b=r_b, r_fcb=r_fcb)

    @jax.jit
    def forward(x, slab_arg):
        B, T, I_in = x.shape
        assert I_in == I
        Bp = _round_up(B, 8)   # full sublane tiles for per-step slices & output store
        x_p = jnp.pad(x.astype(jnp.float32),
                      ((0, Bp - B), (0, 0), (0, I_pad - I)))         # (Bp, T, I_pad)
        # Time-major dense slab: row t*Bp + b = x[b, t].
        x_tm = jnp.transpose(x_p, (1, 0, 2)).reshape(T * Bp, I_pad)

        vmem = pl.BlockSpec(memory_space=pltpu.MemorySpace.VMEM)
        cost = pl.CostEstimate(
            flops=2 * (T * Bp * I_pad * W_slab + T * Bp * H * G + Bp * 2 * H * O_pad),
            transcendentals=(T + 1) * Bp * 5 * H,
            bytes_accessed=4 * (x_tm.size + slab_arg.size + Bp * O_pad),
        )
        out = pl.pallas_call(
            functools.partial(bilstm_fc_kernel, T=T, Bp=Bp, **kernel_meta),
            out_shape=jax.ShapeDtypeStruct((Bp, O_pad), jnp.float32),
            in_specs=[vmem, vmem],
            out_specs=vmem,
            cost_estimate=cost,
        )(x_tm, slab_arg)
        return out[:B, :O]

    return lambda x: forward(x, slab)


def rnn_reference(x, params):
    """Pure-JAX reference of the PyTorch forward (eval mode)."""
    B, T, _ = x.shape
    H = params["w_hh_f"].shape[1]

    def run_dir(xs, w_ih, w_hh, b_ih, b_hh):
        h = jnp.zeros((B, H), jnp.float32)
        c = jnp.zeros((B, H), jnp.float32)
        outs = []
        for t in range(xs.shape[1]):
            g = xs[:, t] @ w_ih.T + b_ih + h @ w_hh.T + b_hh
            i = jax.nn.sigmoid(g[:, :H])
            f = jax.nn.sigmoid(g[:, H:2 * H])
            gg = jnp.tanh(g[:, 2 * H:3 * H])
            o = jax.nn.sigmoid(g[:, 3 * H:])
            c = f * c + i * gg
            h = o * jnp.tanh(c)
            outs.append(h)
        return jnp.stack(outs, axis=1)

    out_f = run_dir(x, params["w_ih_f"], params["w_hh_f"],
                    params["b_ih_f"], params["b_hh_f"])
    out_b = run_dir(x[:, ::-1], params["w_ih_b"], params["w_hh_b"],
                    params["b_ih_b"], params["b_hh_b"])[:, ::-1]
    feat = jnp.concatenate([out_f[:, -1], out_b[:, -1]], axis=-1)
    return feat @ params["fc_w"].T + params["fc_b"]


def init_params(key, input_size, hidden_size, output_size):
    """Deterministic uniform(-1/sqrt(H), 1/sqrt(H)) init, PyTorch-convention shapes."""
    H, I, O = hidden_size, input_size, output_size
    k = 1.0 / np.sqrt(H)
    names_shapes = [
        ("w_ih_f", (4 * H, I)), ("w_hh_f", (4 * H, H)),
        ("b_ih_f", (4 * H,)), ("b_hh_f", (4 * H,)),
        ("w_ih_b", (4 * H, I)), ("w_hh_b", (4 * H, H)),
        ("b_ih_b", (4 * H,)), ("b_hh_b", (4 * H,)),
        ("fc_w", (O, 2 * H)), ("fc_b", (O,)),
    ]
    keys = jax.random.split(key, len(names_shapes))
    return {n: jax.random.uniform(kk, s, jnp.float32, -k, k)
            for kk, (n, s) in zip(keys, names_shapes)}


if __name__ == "__main__":
    B, T, INPUT, HIDDEN, OUT = 2, 8, 16, 32, 10

    root = jax.random.PRNGKey(0)
    kx, kp = jax.random.split(root)
    x = jax.random.normal(kx, (B, T, INPUT), jnp.float32)
    params = init_params(kp, INPUT, HIDDEN, OUT)

    rnn_forward = make_rnn_forward(params, INPUT)   # one-time weight packing
    y = rnn_forward(x)
    jax.block_until_ready(y)

    y_ref = rnn_reference(x, params)
    np.testing.assert_allclose(np.asarray(y), np.asarray(y_ref),
                               rtol=1e-4, atol=1e-4)
    assert y.shape == (B, OUT)
    print("KERNEL_OK")
</pallas_src>

<mosaic_0001>
module attributes {stable_mosaic.version = 11 : i64} {
  func.func @bilstm_fc_kernel(%arg0: memref<64x16xf32, #tpu.memory_space<vmem>>, %arg1: memref<120x256xf32, #tpu.memory_space<vmem>>, %arg2: memref<8x128xf32, #tpu.memory_space<vmem>>) attributes {dimension_semantics = [], scalar_prefetch = 0 : i64, scratch_operands = 0 : i64, tpu.core_type = #tpu.core_type<tc>} {
    %c0 = arith.constant 0 : index
    %c0_0 = arith.constant 0 : index
    %0 = vector.load %arg0[%c0, %c0_0] : memref<64x16xf32, #tpu.memory_space<vmem>>, vector<64x16xf32>
    %c0_1 = arith.constant 0 : index
    %c0_2 = arith.constant 0 : index
    %1 = vector.load %arg1[%c0_1, %c0_2] : memref<120x256xf32, #tpu.memory_space<vmem>>, vector<16x256xf32>
    %c112 = arith.constant 112 : index
    %c0_3 = arith.constant 0 : index
    %2 = vector.load %arg1[%c112, %c0_3] : memref<120x256xf32, #tpu.memory_space<vmem>>, vector<1x256xf32>
    %c16 = arith.constant 16 : index
    %c0_4 = arith.constant 0 : index
    %3 = vector.load %arg1[%c16, %c0_4] : memref<120x256xf32, #tpu.memory_space<vmem>>, vector<32x128xf32>
    %c48 = arith.constant 48 : index
    %c0_5 = arith.constant 0 : index
    %4 = vector.load %arg1[%c48, %c0_5] : memref<120x256xf32, #tpu.memory_space<vmem>>, vector<64x128xf32>
    %c113 = arith.constant 113 : index
    %c0_6 = arith.constant 0 : index
    %5 = vector.load %arg1[%c113, %c0_6] : memref<120x256xf32, #tpu.memory_space<vmem>>, vector<1x128xf32>
    %cst = arith.constant dense<0.000000e+00> : vector<64x256xf32>
    %6 = tpu.matmul %0, %1, %cst {dimension_numbers = #tpu.dot_dimension_numbers<[1], [0], [0], [1], [0, 0, 1, 1], [], []>} : vector<64x16xf32>, vector<16x256xf32>, vector<64x256xf32> -> vector<64x256xf32>
    %7 = vector.broadcast %2 : vector<1x256xf32> to vector<64x256xf32>
    %8 = arith.addf %6, %7 : vector<64x256xf32>
    %cst_7 = arith.constant 0.000000e+00 : f32
    %9 = vector.broadcast %cst_7 : f32 to vector<8x32xf32>
    %cst_8 = arith.constant 0.000000e+00 : f32
    %10 = vector.broadcast %cst_8 : f32 to vector<8x32xf32>
    %11 = vector.extract_strided_slice %8 {offsets = [0, 0], sizes = [8, 128], strides = [1, 1]} : vector<64x256xf32> to vector<8x128xf32>
    %cst_9 = arith.constant dense<0.000000e+00> : vector<8x128xf32>
    %12 = tpu.matmul %9, %3, %cst_9 {dimension_numbers = #tpu.dot_dimension_numbers<[1], [0], [0], [1], [0, 0, 1, 1], [], []>} : vector<8x32xf32>, vector<32x128xf32>, vector<8x128xf32> -> vector<8x128xf32>
    %13 = arith.addf %11, %12 : vector<8x128xf32>
    %14 = math.tanh %13 : vector<8x128xf32>
    %15 = vector.extract_strided_slice %14 {offsets = [0, 0], sizes = [8, 96], strides = [1, 1]} : vector<8x128xf32> to vector<8x96xf32>
    %cst_10 = arith.constant 5.000000e-01 : f32
    %16 = vector.broadcast %cst_10 : f32 to vector<8x96xf32>
    %17 = arith.mulf %16, %15 : vector<8x96xf32>
    %cst_11 = arith.constant 5.000000e-01 : f32
    %18 = vector.broadcast %cst_11 : f32 to vector<8x96xf32>
    %19 = arith.addf %17, %18 : vector<8x96xf32>
    %20 = vector.extract_strided_slice %14 {offsets = [0, 96], sizes = [8, 32], strides = [1, 1]} : vector<8x128xf32> to vector<8x32xf32>
    %21 = vector.extract_strided_slice %19 {offsets = [0, 0], sizes = [8, 32], strides = [1, 1]} : vector<8x96xf32> to vector<8x32xf32>
    %22 = vector.extract_strided_slice %19 {offsets = [0, 32], sizes = [8, 32], strides = [1, 1]} : vector<8x96xf32> to vector<8x32xf32>
    %23 = vector.extract_strided_slice %19 {offsets = [0, 64], sizes = [8, 32], strides = [1, 1]} : vector<8x96xf32> to vector<8x32xf32>
    %24 = arith.mulf %22, %10 : vector<8x32xf32>
    %25 = arith.mulf %21, %20 : vector<8x32xf32>
    %26 = arith.addf %24, %25 : vector<8x32xf32>
    %27 = math.tanh %26 : vector<8x32xf32>
    %28 = arith.mulf %23, %27 : vector<8x32xf32>
    %29 = vector.extract_strided_slice %8 {offsets = [8, 0], sizes = [8, 128], strides = [1, 1]} : vector<64x256xf32> to vector<8x128xf32>
    %cst_12 = arith.constant dense<0.000000e+00> : vector<8x128xf32>
    %30 = tpu.matmul %28, %3, %cst_12 {dimension_numbers = #tpu.dot_dimension_numbers<[1], [0], [0], [1], [0, 0, 1, 1], [], []>} : vector<8x32xf32>, vector<32x128xf32>, vector<8x128xf32> -> vector<8x128xf32>
    %31 = arith.addf %29, %30 : vector<8x128xf32>
    %32 = math.tanh %31 : vector<8x128xf32>
    %33 = vector.extract_strided_slice %32 {offsets = [0, 0], sizes = [8, 96], strides = [1, 1]} : vector<8x128xf32> to vector<8x96xf32>
    %cst_13 = arith.constant 5.000000e-01 : f32
    %34 = vector.broadcast %cst_13 : f32 to vector<8x96xf32>
    %35 = arith.mulf %34, %33 : vector<8x96xf32>
    %cst_14 = arith.constant 5.000000e-01 : f32
    %36 = vector.broadcast %cst_14 : f32 to vector<8x96xf32>
    %37 = arith.addf %35, %36 : vector<8x96xf32>
    %38 = vector.extract_strided_slice %32 {offsets = [0, 96], sizes = [8, 32], strides = [1, 1]} : vector<8x128xf32> to vector<8x32xf32>
    %39 = vector.extract_strided_slice %37 {offsets = [0, 0], sizes = [8, 32], strides = [1, 1]} : vector<8x96xf32> to vector<8x32xf32>
    %40 = vector.extract_strided_slice %37 {offsets = [0, 32], sizes = [8, 32], strides = [1, 1]} : vector<8x96xf32> to vector<8x32xf32>
    %41 = vector.extract_strided_slice %37 {offsets = [0, 64], sizes = [8, 32], strides = [1, 1]} : vector<8x96xf32> to vector<8x32xf32>
    %42 = arith.mulf %40, %26 : vector<8x32xf32>
    %43 = arith.mulf %39, %38 : vector<8x32xf32>
    %44 = arith.addf %42, %43 : vector<8x32xf32>
    %45 = math.tanh %44 : vector<8x32xf32>
    %46 = arith.mulf %41, %45 : vector<8x32xf32>
    %47 = vector.extract_strided_slice %8 {offsets = [16, 0], sizes = [8, 128], strides = [1, 1]} : vector<64x256xf32> to vector<8x128xf32>
    %cst_15 = arith.constant dense<0.000000e+00> : vector<8x128xf32>
    %48 = tpu.matmul %46, %3, %cst_15 {dimension_numbers = #tpu.dot_dimension_numbers<[1], [0], [0], [1], [0, 0, 1, 1], [], []>} : vector<8x32xf32>, vector<32x128xf32>, vector<8x128xf32> -> vector<8x128xf32>
    %49 = arith.addf %47, %48 : vector<8x128xf32>
    %50 = math.tanh %49 : vector<8x128xf32>
    %51 = vector.extract_strided_slice %50 {offsets = [0, 0], sizes = [8, 96], strides = [1, 1]} : vector<8x128xf32> to vector<8x96xf32>
    %cst_16 = arith.constant 5.000000e-01 : f32
    %52 = vector.broadcast %cst_16 : f32 to vector<8x96xf32>
    %53 = arith.mulf %52, %51 : vector<8x96xf32>
    %cst_17 = arith.constant 5.000000e-01 : f32
    %54 = vector.broadcast %cst_17 : f32 to vector<8x96xf32>
    %55 = arith.addf %53, %54 : vector<8x96xf32>
    %56 = vector.extract_strided_slice %50 {offsets = [0, 96], sizes = [8, 32], strides = [1, 1]} : vector<8x128xf32> to vector<8x32xf32>
    %57 = vector.extract_strided_slice %55 {offsets = [0, 0], sizes = [8, 32], strides = [1, 1]} : vector<8x96xf32> to vector<8x32xf32>
    %58 = vector.extract_strided_slice %55 {offsets = [0, 32], sizes = [8, 32], strides = [1, 1]} : vector<8x96xf32> to vector<8x32xf32>
    %59 = vector.extract_strided_slice %55 {offsets = [0, 64], sizes = [8, 32], strides = [1, 1]} : vector<8x96xf32> to vector<8x32xf32>
    %60 = arith.mulf %58, %44 : vector<8x32xf32>
    %61 = arith.mulf %57, %56 : vector<8x32xf32>
    %62 = arith.addf %60, %61 : vector<8x32xf32>
    %63 = math.tanh %62 : vector<8x32xf32>
    %64 = arith.mulf %59, %63 : vector<8x32xf32>
    %65 = vector.extract_strided_slice %8 {offsets = [24, 0], sizes = [8, 128], strides = [1, 1]} : vector<64x256xf32> to vector<8x128xf32>
    %cst_18 = arith.constant dense<0.000000e+00> : vector<8x128xf32>
    %66 = tpu.matmul %64, %3, %cst_18 {dimension_numbers = #tpu.dot_dimension_numbers<[1], [0], [0], [1], [0, 0, 1, 1], [], []>} : vector<8x32xf32>, vector<32x128xf32>, vector<8x128xf32> -> vector<8x128xf32>
    %67 = arith.addf %65, %66 : vector<8x128xf32>
    %68 = math.tanh %67 : vector<8x128xf32>
    %69 = vector.extract_strided_slice %68 {offsets = [0, 0], sizes = [8, 96], strides = [1, 1]} : vector<8x128xf32> to vector<8x96xf32>
    %cst_19 = arith.constant 5.000000e-01 : f32
    %70 = vector.broadcast %cst_19 : f32 to vector<8x96xf32>
    %71 = arith.mulf %70, %69 : vector<8x96xf32>
    %cst_20 = arith.constant 5.000000e-01 : f32
    %72 = vector.broadcast %cst_20 : f32 to vector<8x96xf32>
    %73 = arith.addf %71, %72 : vector<8x96xf32>
    %74 = vector.extract_strided_slice %68 {offsets = [0, 96], sizes = [8, 32], strides = [1, 1]} : vector<8x128xf32> to vector<8x32xf32>
    %75 = vector.extract_strided_slice %73 {offsets = [0, 0], sizes = [8, 32], strides = [1, 1]} : vector<8x96xf32> to vector<8x32xf32>
    %76 = vector.extract_strided_slice %73 {offsets = [0, 32], sizes = [8, 32], strides = [1, 1]} : vector<8x96xf32> to vector<8x32xf32>
    %77 = vector.extract_strided_slice %73 {offsets = [0, 64], sizes = [8, 32], strides = [1, 1]} : vector<8x96xf32> to vector<8x32xf32>
    %78 = arith.mulf %76, %62 : vector<8x32xf32>
    %79 = arith.mulf %75, %74 : vector<8x32xf32>
    %80 = arith.addf %78, %79 : vector<8x32xf32>
    %81 = math.tanh %80 : vector<8x32xf32>
    %82 = arith.mulf %77, %81 : vector<8x32xf32>
    %83 = vector.extract_strided_slice %8 {offsets = [32, 0], sizes = [8, 128], strides = [1, 1]} : vector<64x256xf32> to vector<8x128xf32>
    %cst_21 = arith.constant dense<0.000000e+00> : vector<8x128xf32>
    %84 = tpu.matmul %82, %3, %cst_21 {dimension_numbers = #tpu.dot_dimension_numbers<[1], [0], [0], [1], [0, 0, 1, 1], [], []>} : vector<8x32xf32>, vector<32x128xf32>, vector<8x128xf32> -> vector<8x128xf32>
    %85 = arith.addf %83, %84 : vector<8x128xf32>
    %86 = math.tanh %85 : vector<8x128xf32>
    %87 = vector.extract_strided_slice %86 {offsets = [0, 0], sizes = [8, 96], strides = [1, 1]} : vector<8x128xf32> to vector<8x96xf32>
    %cst_22 = arith.constant 5.000000e-01 : f32
    %88 = vector.broadcast %cst_22 : f32 to vector<8x96xf32>
    %89 = arith.mulf %88, %87 : vector<8x96xf32>
    %cst_23 = arith.constant 5.000000e-01 : f32
    %90 = vector.broadcast %cst_23 : f32 to vector<8x96xf32>
    %91 = arith.addf %89, %90 : vector<8x96xf32>
    %92 = vector.extract_strided_slice %86 {offsets = [0, 96], sizes = [8, 32], strides = [1, 1]} : vector<8x128xf32> to vector<8x32xf32>
    %93 = vector.extract_strided_slice %91 {offsets = [0, 0], sizes = [8, 32], strides = [1, 1]} : vector<8x96xf32> to vector<8x32xf32>
    %94 = vector.extract_strided_slice %91 {offsets = [0, 32], sizes = [8, 32], strides = [1, 1]} : vector<8x96xf32> to vector<8x32xf32>
    %95 = vector.extract_strided_slice %91 {offsets = [0, 64], sizes = [8, 32], strides = [1, 1]} : vector<8x96xf32> to vector<8x32xf32>
    %96 = arith.mulf %94, %80 : vector<8x32xf32>
    %97 = arith.mulf %93, %92 : vector<8x32xf32>
    %98 = arith.addf %96, %97 : vector<8x32xf32>
    %99 = math.tanh %98 : vector<8x32xf32>
    %100 = arith.mulf %95, %99 : vector<8x32xf32>
    %101 = vector.extract_strided_slice %8 {offsets = [40, 0], sizes = [8, 128], strides = [1, 1]} : vector<64x256xf32> to vector<8x128xf32>
    %cst_24 = arith.constant dense<0.000000e+00> : vector<8x128xf32>
    %102 = tpu.matmul %100, %3, %cst_24 {dimension_numbers = #tpu.dot_dimension_numbers<[1], [0], [0], [1], [0, 0, 1, 1], [], []>} : vector<8x32xf32>, vector<32x128xf32>, vector<8x128xf32> -> vector<8x128xf32>
    %103 = arith.addf %101, %102 : vector<8x128xf32>
    %104 = math.tanh %103 : vector<8x128xf32>
    %105 = vector.extract_strided_slice %104 {offsets = [0, 0], sizes = [8, 96], strides = [1, 1]} : vector<8x128xf32> to vector<8x96xf32>
    %cst_25 = arith.constant 5.000000e-01 : f32
    %106 = vector.broadcast %cst_25 : f32 to vector<8x96xf32>
    %107 = arith.mulf %106, %105 : vector<8x96xf32>
    %cst_26 = arith.constant 5.000000e-01 : f32
    %108 = vector.broadcast %cst_26 : f32 to vector<8x96xf32>
    %109 = arith.addf %107, %108 : vector<8x96xf32>
    %110 = vector.extract_strided_slice %104 {offsets = [0, 96], sizes = [8, 32], strides = [1, 1]} : vector<8x128xf32> to vector<8x32xf32>
    %111 = vector.extract_strided_slice %109 {offsets = [0, 0], sizes = [8, 32], strides = [1, 1]} : vector<8x96xf32> to vector<8x32xf32>
    %112 = vector.extract_strided_slice %109 {offsets = [0, 32], sizes = [8, 32], strides = [1, 1]} : vector<8x96xf32> to vector<8x32xf32>
    %113 = vector.extract_strided_slice %109 {offsets = [0, 64], sizes = [8, 32], strides = [1, 1]} : vector<8x96xf32> to vector<8x32xf32>
    %114 = arith.mulf %112, %98 : vector<8x32xf32>
    %115 = arith.mulf %111, %110 : vector<8x32xf32>
    %116 = arith.addf %114, %115 : vector<8x32xf32>
    %117 = math.tanh %116 : vector<8x32xf32>
    %118 = arith.mulf %113, %117 : vector<8x32xf32>
    %119 = vector.extract_strided_slice %8 {offsets = [48, 0], sizes = [8, 128], strides = [1, 1]} : vector<64x256xf32> to vector<8x128xf32>
    %cst_27 = arith.constant dense<0.000000e+00> : vector<8x128xf32>
    %120 = tpu.matmul %118, %3, %cst_27 {dimension_numbers = #tpu.dot_dimension_numbers<[1], [0], [0], [1], [0, 0, 1, 1], [], []>} : vector<8x32xf32>, vector<32x128xf32>, vector<8x128xf32> -> vector<8x128xf32>
    %121 = arith.addf %119, %120 : vector<8x128xf32>
    %122 = math.tanh %121 : vector<8x128xf32>
    %123 = vector.extract_strided_slice %122 {offsets = [0, 0], sizes = [8, 96], strides = [1, 1]} : vector<8x128xf32> to vector<8x96xf32>
    %cst_28 = arith.constant 5.000000e-01 : f32
    %124 = vector.broadcast %cst_28 : f32 to vector<8x96xf32>
    %125 = arith.mulf %124, %123 : vector<8x96xf32>
    %cst_29 = arith.constant 5.000000e-01 : f32
    %126 = vector.broadcast %cst_29 : f32 to vector<8x96xf32>
    %127 = arith.addf %125, %126 : vector<8x96xf32>
    %128 = vector.extract_strided_slice %122 {offsets = [0, 96], sizes = [8, 32], strides = [1, 1]} : vector<8x128xf32> to vector<8x32xf32>
    %129 = vector.extract_strided_slice %127 {offsets = [0, 0], sizes = [8, 32], strides = [1, 1]} : vector<8x96xf32> to vector<8x32xf32>
    %130 = vector.extract_strided_slice %127 {offsets = [0, 32], sizes = [8, 32], strides = [1, 1]} : vector<8x96xf32> to vector<8x32xf32>
    %131 = vector.extract_strided_slice %127 {offsets = [0, 64], sizes = [8, 32], strides = [1, 1]} : vector<8x96xf32> to vector<8x32xf32>
    %132 = arith.mulf %130, %116 : vector<8x32xf32>
    %133 = arith.mulf %129, %128 : vector<8x32xf32>
    %134 = arith.addf %132, %133 : vector<8x32xf32>
    %135 = math.tanh %134 : vector<8x32xf32>
    %136 = arith.mulf %131, %135 : vector<8x32xf32>
    %137 = vector.extract_strided_slice %8 {offsets = [56, 0], sizes = [8, 128], strides = [1, 1]} : vector<64x256xf32> to vector<8x128xf32>
    %cst_30 = arith.constant dense<0.000000e+00> : vector<8x128xf32>
    %138 = tpu.matmul %136, %3, %cst_30 {dimension_numbers = #tpu.dot_dimension_numbers<[1], [0], [0], [1], [0, 0, 1, 1], [], []>} : vector<8x32xf32>, vector<32x128xf32>, vector<8x128xf32> -> vector<8x128xf32>
    %139 = arith.addf %137, %138 : vector<8x128xf32>
    %140 = math.tanh %139 : vector<8x128xf32>
    %141 = vector.extract_strided_slice %140 {offsets = [0, 0], sizes = [8, 96], strides = [1, 1]} : vector<8x128xf32> to vector<8x96xf32>
    %cst_31 = arith.constant 5.000000e-01 : f32
    %142 = vector.broadcast %cst_31 : f32 to vector<8x96xf32>
    %143 = arith.mulf %142, %141 : vector<8x96xf32>
    %cst_32 = arith.constant 5.000000e-01 : f32
    %144 = vector.broadcast %cst_32 : f32 to vector<8x96xf32>
    %145 = arith.addf %143, %144 : vector<8x96xf32>
    %146 = vector.extract_strided_slice %140 {offsets = [0, 96], sizes = [8, 32], strides = [1, 1]} : vector<8x128xf32> to vector<8x32xf32>
    %147 = vector.extract_strided_slice %145 {offsets = [0, 0], sizes = [8, 32], strides = [1, 1]} : vector<8x96xf32> to vector<8x32xf32>
    %148 = vector.extract_strided_slice %145 {offsets = [0, 32], sizes = [8, 32], strides = [1, 1]} : vector<8x96xf32> to vector<8x32xf32>
    %149 = vector.extract_strided_slice %145 {offsets = [0, 64], sizes = [8, 32], strides = [1, 1]} : vector<8x96xf32> to vector<8x32xf32>
    %150 = arith.mulf %148, %134 : vector<8x32xf32>
    %151 = arith.mulf %147, %146 : vector<8x32xf32>
    %152 = arith.addf %150, %151 : vector<8x32xf32>
    %153 = math.tanh %152 : vector<8x32xf32>
    %154 = arith.mulf %149, %153 : vector<8x32xf32>
    %155 = vector.extract_strided_slice %8 {offsets = [56, 128], sizes = [8, 128], strides = [1, 1]} : vector<64x256xf32> to vector<8x128xf32>
    %cst_33 = arith.constant 0.000000e+00 : f32
    %156 = vector.broadcast %cst_33 : f32 to vector<8x32xf32>
    %157 = math.tanh %155 : vector<8x128xf32>
    %158 = vector.extract_strided_slice %157 {offsets = [0, 0], sizes = [8, 96], strides = [1, 1]} : vector<8x128xf32> to vector<8x96xf32>
    %cst_34 = arith.constant 5.000000e-01 : f32
    %159 = vector.broadcast %cst_34 : f32 to vector<8x96xf32>
    %160 = arith.mulf %159, %158 : vector<8x96xf32>
    %cst_35 = arith.constant 5.000000e-01 : f32
    %161 = vector.broadcast %cst_35 : f32 to vector<8x96xf32>
    %162 = arith.addf %160, %161 : vector<8x96xf32>
    %163 = vector.extract_strided_slice %157 {offsets = [0, 96], sizes = [8, 32], strides = [1, 1]} : vector<8x128xf32> to vector<8x32xf32>
    %164 = vector.extract_strided_slice %162 {offsets = [0, 0], sizes = [8, 32], strides = [1, 1]} : vector<8x96xf32> to vector<8x32xf32>
    %165 = vector.extract_strided_slice %162 {offsets = [0, 32], sizes = [8, 32], strides = [1, 1]} : vector<8x96xf32> to vector<8x32xf32>
    %166 = vector.extract_strided_slice %162 {offsets = [0, 64], sizes = [8, 32], strides = [1, 1]} : vector<8x96xf32> to vector<8x32xf32>
    %167 = arith.mulf %165, %156 : vector<8x32xf32>
    %168 = arith.mulf %164, %163 : vector<8x32xf32>
    %169 = arith.addf %167, %168 : vector<8x32xf32>
    %170 = math.tanh %169 : vector<8x32xf32>
    %171 = arith.mulf %166, %170 : vector<8x32xf32>
    %172 = vector.extract_strided_slice %4 {offsets = [0, 0], sizes = [32, 128], strides = [1, 1]} : vector<64x128xf32> to vector<32x128xf32>
    %cst_36 = arith.constant dense<0.000000e+00> : vector<8x128xf32>
    %173 = tpu.matmul %154, %172, %cst_36 {dimension_numbers = #tpu.dot_dimension_numbers<[1], [0], [0], [1], [0, 0, 1, 1], [], []>} : vector<8x32xf32>, vector<32x128xf32>, vector<8x128xf32> -> vector<8x128xf32>
    %174 = vector.extract_strided_slice %4 {offsets = [32, 0], sizes = [32, 128], strides = [1, 1]} : vector<64x128xf32> to vector<32x128xf32>
    %cst_37 = arith.constant dense<0.000000e+00> : vector<8x128xf32>
    %175 = tpu.matmul %171, %174, %cst_37 {dimension_numbers = #tpu.dot_dimension_numbers<[1], [0], [0], [1], [0, 0, 1, 1], [], []>} : vector<8x32xf32>, vector<32x128xf32>, vector<8x128xf32> -> vector<8x128xf32>
    %176 = arith.addf %173, %175 : vector<8x128xf32>
    %177 = vector.broadcast %5 : vector<1x128xf32> to vector<8x128xf32>
    %178 = arith.addf %176, %177 : vector<8x128xf32>
    %c0_38 = arith.constant 0 : index
    %c0_39 = arith.constant 0 : index
    %179 = vector.load %arg2[%c0_38, %c0_39] : memref<8x128xf32, #tpu.memory_space<vmem>>, vector<8x128xf32>
    tpu.vector_store %arg2[%c0_38, %c0_39], %178 {strides = array<i32>} : memref<8x128xf32, #tpu.memory_space<vmem>>, vector<8x128xf32>,
    return
  }
}

</mosaic_0001>

<bundles_post_ra>
// kernel: forward.1
= control target key start
LH: loop header
LB: loop body
LE: loop exit
PB: predicated region body
PF: predicated region fallthrough
CT: control target
= control target key end

     0   :  { %7 = vsyncpa [#allocation3], 0  ;;  %s1461_s9 = smov [#allocation2]   ;;  %s1663_s0 = inlined_call_operand.vmem [shape: f32[64,16], index: 0, kind: input, shape index: {}]   ;;  %s1664_s1 = inlined_call_operand.hbm [shape: f32[120,256], index: 1, kind: input, shape index: {}]   ;;  %s1665_s2 = inlined_call_operand.vmem [shape: f32[8,128], index: 2, kind: output, shape index: {}]  }
   0x1   :  { %s15_s10 = sshll.u32 %s1461_s9, 4  ;;  %s1437_s13 = scalar_lea.hbm %s1664_s1, 3840  ;;  %s16_s10 = int_to_ptr.vmem [resolvable:$true] %s15_s10 }
   0x2   :  { %p1438_p0 = scmp.ne.s32.totalorder %s1664_s1, %s1437_s13  ;;  %p1441_p1 = scmp.lt.u32.totalorder %s1437_s13, %s1664_s1 }
   0x4   :  { %p1443_p2 = pnand %p1441_p1, %p1438_p0 }
   0x6   :  { %1446 = shalt.err (!%p1443_p2)
}
   0x7   :  { %s1447_s18 = scalar_lea.vmem %s16_s10, 3840  ;;  %p1452_p4 = scmp.lt.s32.totalorder %s16_s10, %s16_s10 }
   0x8   :  { %p1448_p3 = scmp.ne.s32.totalorder %s16_s10, %s1447_s18  ;;  %p1453_p5 = scmp.lt.s32.totalorder %s1447_s18, %s1447_s18 }
   0xa   :  { %p1454_p6 = por %p1453_p5, %p1452_p4 }
   0xc   :  { %p1455_p7 = pnand %p1454_p6, %p1448_p3 }
   0xe   :  { %1458 = shalt.err (!%p1455_p7)
}
   0xf   :  { %s1462_s19 = smov 256   ;;  %s1463_s20 = smov 16  }
  0x10   :  { %21 = dma.hbm_to_vmem [thread:$0]  %s1664_s1, 3840, %s16_s10, [#allocation3], %s1462_s19, %s1462_s19, %s1463_s20  }
  0x11   :  { %1459 = dma.done.wait [#allocation3], 3840  }
  0x12   :  { %1460 = vsyncadd [#allocation3], 4294963456  ;;  %v1464_v0 = vmov 0.0|0.0   ;;  %v1465_v1 = vmov 0.0   ;;  %vm1466_vm0 = vmmov 0   ;;  %v34_v2 = vld [vmem:[#allocation2 + $0x8] sm:$0xff]  ;;  %v53_v15 = vlaneseq }
  0x13   :  { %1319 = vmatprep.subr.bf16.mxu0 %v1464_v0  ;;  %152 = vmatprep.mubr.f32.mxu1 %v1465_v1  ;;  %v36_v3 = vld [vmem:[#allocation2 + $0x18] sm:$0xff]  ;;  %v39_v4 = vld [vmem:[#allocation2 + $0x20] sm:$0xff]  ;;  %v40_v6 = vld [vmem:[#allocation2 + $0x30] sm:$0xff]  ;;  %vm63_vm1 = vcmask 130048   ;;  %s1467_s24 = smov 32   ;;  %s1468_s27 = smov 64  }
  0x14   :  { %1213 = vmatprep.mubr.msk.f32.mxu0 %vm1466_vm0, %v1465_v1  ;;  %v1315_v5 = vpack.c.bf16 %v36_v3, %v34_v2  ;;  %v33_v7 = vld [vmem:[#allocation2] sm:$0xff]  ;;  %v35_v8 = vld [vmem:[#allocation2 + $0x10] sm:$0xff]  ;;  %v1500_v9 = vpack.c.bf16 %v40_v6, %v39_v4  ;;  %v1525_v16 = vshrl.u32 %v53_v15, 7  ;;  %v26_v34 = vld [vmem:[%s1663_s0 + $0x8] sm:$0xff]  ;;  %vm194_vm2 = vcmask 261120  }
  0x15   :  { %v1317_v10 = vpack.c.bf16 %v35_v8, %v33_v7  ;;  %v41_v11 = vld [vmem:[#allocation2 + $0x40] sm:$0xff]  ;;  %v42_v12 = vld [vmem:[#allocation2 + $0x50] sm:$0xff] }
  0x16   :  { %1316 = vmatprep.subr.bf16.mxu1 %v1315_v5  ;;  %1321 = vmatpush3.bf16.msra.mxu0 %v1500_v9  ;;  %v25_v13 = vld [vmem:[%s1663_s0] sm:$0xff]  ;;  %v1506_v14 = vpack.c.bf16 %v42_v12, %v41_v11  ;;  %v55_v17 = vsub.s32 0, %v1525_v16  ;;  %v27_v53 = vld [vmem:[%s1663_s0 + $0x10] sm:$0xff]  ;;  %v28_v11 = vld [vmem:[%s1663_s0 + $0x18] sm:$0xff] }
  0x17   :  { %1318 = vmatpush1.bf16.msra.mxu1 %v1317_v10  ;;  %1322 = vmatprep.subr.bf16.mxu0 %v1464_v0  ;;  %v1528_v18 = vld [vmem:[#allocation2 + $0xe0] ss:$8 sm:$0x3] }
  0x18   :  { %1361 = vmatprep.subr.bf16.mxu1 %v1464_v0  ;;  %v1531_v19 = vrot.slane %v1528_v18, %v55_v17 }
  0x1a   :  { %1138 = vmatmul.mubr.msk.f32.vlgmr.msra.gmra.mrb[0].mxu1 %vm63_vm1, %v25_v13  ;;  %1324 = vmatpush3.bf16.msra.mxu0 %v1506_v14 }
  0x1b   :  { %157 = vmatprep.mubr.f32.mxu1 %v1465_v1  ;;  %1325 = vmatprep.subr.bf16.mxu0 %v1464_v0 }
  0x1c   :  { %1363 = vmatpush3.bf16.msra.mxu1 %v1500_v9 }
  0x1d   :  { %1364 = vmatprep.subr.bf16.mxu1 %v1464_v0  ;;  %1214 = vmatmul.mubr.f32.vlgmr.msra.gmra.mrb[0].mxu0 %v1465_v1 }
  0x1e   :  { %1327 = vmatpush3.bf16.msra.mxu0 %v1500_v9  ;;  %1224 = vmatprep.mubr.msk.f32.mxu0 %vm1466_vm0, %v1465_v1 }
  0x1f   :  { %1328 = vmatprep.subr.bf16.mxu0 %v1464_v0  ;;  %1139 = vmatmul.mubr.msk.f32.gmra.mrb[2].mxu1 %vm63_vm1, %v26_v34  ;;  %v29_v34 = vld [vmem:[%s1663_s0 + $0x20] sm:$0xff] }
  0x20   :  { %1366 = vmatpush3.bf16.msra.mxu1 %v1506_v14  ;;  %162 = vmatprep.mubr.f32.mxu1 %v1465_v1 }
  0x21   :  { %1367 = vmatprep.subr.bf16.mxu1 %v1464_v0 }
  0x22   :  { %1330 = vmatpush3.bf16.msra.mxu0 %v1506_v14 }
  0x23   :  { %1331 = vmatprep.subr.bf16.mxu0 %v1464_v0  ;;  %1140 = vmatmul.mubr.msk.f32.gmra.mrb[4].mxu1 %vm63_vm1, %v27_v53  ;;  %v30_v53 = vld [vmem:[%s1663_s0 + $0x28] sm:$0xff] }
  0x24   :  { %167 = vmatprep.mubr.f32.mxu1 %v1465_v1 }
  0x27   :  { %1141 = vmatmul.mubr.msk.f32.gmra.mrb[6].mxu1 %vm63_vm1, %v28_v11 }
  0x28   :  { %172 = vmatprep.mubr.f32.mxu1 %v1465_v1 }
  0x2b   :  { %1142 = vmatmul.mubr.msk.f32.gmra.mrb[8].mxu1 %vm63_vm1, %v29_v34 }
  0x2c   :  { %177 = vmatprep.mubr.f32.mxu1 %v1465_v1 }
  0x2f   :  { %1143 = vmatmul.mubr.msk.f32.gmra.mrb[10].mxu1 %vm63_vm1, %v30_v53  ;;  %v50_v53 = vld [vmem:[#allocation2 + $0xd0] sm:$0xff] }
  0x30   :  { %182 = vmatprep.mubr.f32.mxu1 %v1465_v1 }
  0xed   :  { %v154_v20 = vpop.f32.mrb[0].mxu1 }
  0xee   :  { %v155_v21 = vadd.f32 %v154_v20, %v1531_v19  ;;  %v156_v22 = vpop.f32.mrb[1].mxu1 }
  0xf0   :  { %v264_v23 = vpop.f32.mrb[0].mxu0 }
  0xf1   :  { %v268_v24 = vadd.f32 %v264_v23, %v155_v21  ;;  %v1215_v25 = vpop.f32.mrb[1].mxu0 }
  0xf2   :  { %v159_v38 = vpop.f32.mrb[2].mxu1 }
  0xf3   :  { %1401 = vtanh.f32 %v268_v24  ;;  %v161_v39 = vpop.f32.mrb[3].mxu1  ;;  %v160_v41 = vadd.f32 %v159_v38, %v1531_v19 }
  0xf6   :  { %v164_v57 = vpop.f32.mrb[4].mxu1 }
  0xf7   :  { %v166_v58 = vpop.f32.mrb[5].mxu1  ;;  %v165_v60 = vadd.f32 %v164_v57, %v1531_v19 }
  0xfa   :  { %v169_v17 = vpop.f32.mrb[6].mxu1 }
  0xfb   :  { %v171_v20 = vpop.f32.mrb[7].mxu1  ;;  %v170_v22 = vadd.f32 %v169_v17, %v1531_v19 }
  0xfc   :  { %v32_v20 = vld [vmem:[%s1663_s0 + $0x38] sm:$0xff] }
  0xfd   :  { %v1402_v26 = vpop.eup %1401 }
  0xfe   :  { %274 = vrot.lane.b32.xlu0 %v1402_v26, %s1467_s24  ;;  %v270_v27 = vmul.f32 0.5, %v1402_v26  ;;  %v174_v38 = vpop.f32.mrb[8].mxu1 }
  0xff   :  { %v176_v39 = vpop.f32.mrb[9].mxu1 }
 0x100   :  { %v271_v28 = vadd.f32 0.5, %v270_v27 }
 0x102   :  { %v272_v31 = vmul.f32 0.0, %v271_v28  ;;  %v179_v57 = vpop.f32.mrb[10].mxu1 }
 0x103   :  { %v181_v58 = vpop.f32.mrb[11].mxu1 }
 0x170   :  { %v275_v29 = vpop.permute.xlu0 %274 }
 0x171   :  { %v277_v30 = vmul.f32 %v275_v29, %v271_v28 }
 0x173   :  { %279 = vrot.lane.b32.xlu0 %v277_v30, %s1467_s24 }
 0x1e5   :  { %v280_v32 = vpop.permute.xlu0 %279 }
 0x1e6   :  { %v282_v33 = vadd.f32 %v280_v32, %v272_v31 }
 0x1e8   :  { %1403 = vtanh.f32 %v282_v33 }
 0x1f2   :  { %v1404_v35 = vpop.eup %1403 }
 0x1f3   :  { %285 = vrot.lane.b32.xlu1 %v1404_v35, %s1467_s24 }
 0x265   :  { %v286_v36 = vpop.permute.xlu1 %285 }
 0x266   :  { %v288_v37 = vmul.f32 %v286_v36, %v271_v28 }
 0x268   :  { %290 = vrot.lane.b32.xlu1 %v288_v37, %s1468_s27 }
 0x2da   :  { %v291_v40 = vpop.permute.xlu1 %290 }
 0x2db   :  { %1225 = vmatmul.mubr.msk.f32.vlgmr.msra.gmra.mrb[2].mxu0 %vm194_vm2, %v291_v40 }
 0x2dc   :  { %1333 = vmatpush3.bf16.msra.mxu0 %v1500_v9  ;;  %1235 = vmatprep.mubr.msk.f32.mxu0 %vm1466_vm0, %v1465_v1 }
 0x2dd   :  { %1334 = vmatprep.subr.bf16.mxu0 %v1464_v0 }
 0x2e0   :  { %1336 = vmatpush3.bf16.msra.mxu0 %v1506_v14 }
 0x2e1   :  { %1337 = vmatprep.subr.bf16.mxu0 %v1464_v0 }
 0x3ae   :  { %v360_v42 = vpop.f32.mrb[2].mxu0 }
 0x3af   :  { %v364_v43 = vadd.f32 %v360_v42, %v160_v41  ;;  %v1226_v44 = vpop.f32.mrb[3].mxu0  ;;  %v175_v41 = vadd.f32 %v174_v38, %v1531_v19 }
 0x3b1   :  { %1405 = vtanh.f32 %v364_v43 }
 0x3bb   :  { %v1406_v45 = vpop.eup %1405 }
 0x3bc   :  { %370 = vrot.lane.b32.xlu0 %v1406_v45, %s1467_s24  ;;  %v366_v46 = vmul.f32 0.5, %v1406_v45 }
 0x3be   :  { %v367_v47 = vadd.f32 0.5, %v366_v46 }
 0x3c0   :  { %v368_v50 = vmul.f32 %v367_v47, %v282_v33 }
 0x42e   :  { %v371_v48 = vpop.permute.xlu0 %370 }
 0x42f   :  { %v373_v49 = vmul.f32 %v371_v48, %v367_v47 }
 0x431   :  { %375 = vrot.lane.b32.xlu1 %v373_v49, %s1467_s24 }
 0x4a3   :  { %v376_v51 = vpop.permute.xlu1 %375 }
 0x4a4   :  { %v378_v52 = vadd.f32 %v376_v51, %v368_v50 }
 0x4a6   :  { %1407 = vtanh.f32 %v378_v52 }
 0x4b0   :  { %v1408_v54 = vpop.eup %1407 }
 0x4b1   :  { %381 = vrot.lane.b32.xlu0 %v1408_v54, %s1467_s24 }
 0x523   :  { %v382_v55 = vpop.permute.xlu0 %381 }
 0x524   :  { %v384_v56 = vmul.f32 %v382_v55, %v367_v47 }
 0x526   :  { %386 = vrot.lane.b32.xlu1 %v384_v56, %s1468_s27 }
 0x598   :  { %v387_v59 = vpop.permute.xlu1 %386 }
 0x599   :  { %1236 = vmatmul.mubr.msk.f32.vlgmr.msra.gmra.mrb[4].mxu0 %vm194_vm2, %v387_v59 }
 0x59a   :  { %1339 = vmatpush3.bf16.msra.mxu0 %v1500_v9  ;;  %1246 = vmatprep.mubr.msk.f32.mxu0 %vm1466_vm0, %v1465_v1 }
 0x59b   :  { %1340 = vmatprep.subr.bf16.mxu0 %v1464_v0 }
 0x59e   :  { %1342 = vmatpush3.bf16.msra.mxu0 %v1506_v14 }
 0x59f   :  { %1343 = vmatprep.subr.bf16.mxu0 %v1464_v0 }
 0x66c   :  { %v456_v61 = vpop.f32.mrb[4].mxu0 }
 0x66d   :  { %v460_v62 = vadd.f32 %v456_v61, %v165_v60  ;;  %v1237_v63 = vpop.f32.mrb[5].mxu0  ;;  %v180_v60 = vadd.f32 %v179_v57, %v1531_v19 }
 0x66f   :  { %1409 = vtanh.f32 %v460_v62 }
 0x679   :  { %v1410_v2 = vpop.eup %1409 }
 0x67a   :  { %466 = vrot.lane.b32.xlu0 %v1410_v2, %s1467_s24  ;;  %v462_v3 = vmul.f32 0.5, %v1410_v2 }
 0x67c   :  { %v463_v4 = vadd.f32 0.5, %v462_v3 }
 0x67e   :  { %v464_v7 = vmul.f32 %v463_v4, %v378_v52 }
 0x6ec   :  { %v467_v5 = vpop.permute.xlu0 %466 }
 0x6ed   :  { %v469_v6 = vmul.f32 %v467_v5, %v463_v4 }
 0x6ef   :  { %471 = vrot.lane.b32.xlu1 %v469_v6, %s1467_s24 }
 0x761   :  { %v472_v8 = vpop.permute.xlu1 %471 }
 0x762   :  { %v474_v10 = vadd.f32 %v472_v8, %v464_v7 }
 0x764   :  { %1411 = vtanh.f32 %v474_v10 }
 0x76e   :  { %v1412_v12 = vpop.eup %1411 }
 0x76f   :  { %477 = vrot.lane.b32.xlu0 %v1412_v12, %s1467_s24 }
 0x7e1   :  { %v478_v13 = vpop.permute.xlu0 %477 }
 0x7e2   :  { %v480_v15 = vmul.f32 %v478_v13, %v463_v4 }
 0x7e4   :  { %482 = vrot.lane.b32.xlu1 %v480_v15, %s1468_s27 }
 0x856   :  { %v483_v21 = vpop.permute.xlu1 %482 }
 0x857   :  { %1247 = vmatmul.mubr.msk.f32.vlgmr.msra.gmra.mrb[6].mxu0 %vm194_vm2, %v483_v21 }
 0x858   :  { %1345 = vmatpush3.bf16.msra.mxu0 %v1500_v9  ;;  %1257 = vmatprep.mubr.msk.f32.mxu0 %vm1466_vm0, %v1465_v1 }
 0x859   :  { %1346 = vmatprep.subr.bf16.mxu0 %v1464_v0 }
 0x85c   :  { %1348 = vmatpush3.bf16.msra.mxu0 %v1506_v14 }
 0x85d   :  { %1349 = vmatprep.subr.bf16.mxu0 %v1464_v0 }
 0x92a   :  { %v552_v23 = vpop.f32.mrb[6].mxu0 }
 0x92b   :  { %v556_v24 = vadd.f32 %v552_v23, %v170_v22  ;;  %v1248_v25 = vpop.f32.mrb[7].mxu0 }
 0x92d   :  { %1413 = vtanh.f32 %v556_v24 }
 0x937   :  { %v1414_v26 = vpop.eup %1413 }
 0x938   :  { %562 = vrot.lane.b32.xlu0 %v1414_v26, %s1467_s24  ;;  %v558_v27 = vmul.f32 0.5, %v1414_v26 }
 0x93a   :  { %v559_v28 = vadd.f32 0.5, %v558_v27 }
 0x93c   :  { %v560_v31 = vmul.f32 %v559_v28, %v474_v10 }
 0x9aa   :  { %v563_v29 = vpop.permute.xlu0 %562 }
 0x9ab   :  { %v565_v30 = vmul.f32 %v563_v29, %v559_v28 }
 0x9ad   :  { %567 = vrot.lane.b32.xlu1 %v565_v30, %s1467_s24 }
 0xa1f   :  { %v568_v32 = vpop.permute.xlu1 %567 }
 0xa20   :  { %v570_v33 = vadd.f32 %v568_v32, %v560_v31  ;;  %v59_v32 = vsub.s32 1, %v1525_v16 }
 0xa22   :  { %1415 = vtanh.f32 %v570_v33 }
 0xa2c   :  { %v1416_v35 = vpop.eup %1415 }
 0xa2d   :  { %573 = vrot.lane.b32.xlu0 %v1416_v35, %s1467_s24 }
 0xa9f   :  { %v574_v36 = vpop.permute.xlu0 %573 }
 0xaa0   :  { %v576_v37 = vmul.f32 %v574_v36, %v559_v28 }
 0xaa2   :  { %578 = vrot.lane.b32.xlu1 %v576_v37, %s1468_s27 }
 0xb14   :  { %v579_v40 = vpop.permute.xlu1 %578 }
 0xb15   :  { %1258 = vmatmul.mubr.msk.f32.vlgmr.msra.gmra.mrb[8].mxu0 %vm194_vm2, %v579_v40 }
 0xb16   :  { %1351 = vmatpush3.bf16.msra.mxu0 %v1500_v9  ;;  %1268 = vmatprep.mubr.msk.f32.mxu0 %vm1466_vm0, %v1465_v1 }
 0xb17   :  { %1352 = vmatprep.subr.bf16.mxu0 %v1464_v0 }
 0xb1a   :  { %1354 = vmatpush3.bf16.msra.mxu0 %v1506_v14 }
 0xb1b   :  { %1355 = vmatprep.subr.bf16.mxu0 %v1464_v0 }
 0xbe8   :  { %v648_v42 = vpop.f32.mrb[8].mxu0 }
 0xbe9   :  { %v652_v43 = vadd.f32 %v648_v42, %v175_v41  ;;  %v1259_v44 = vpop.f32.mrb[9].mxu0 }
 0xbeb   :  { %1417 = vtanh.f32 %v652_v43 }
 0xbf5   :  { %v1418_v45 = vpop.eup %1417 }
 0xbf6   :  { %658 = vrot.lane.b32.xlu0 %v1418_v45, %s1467_s24  ;;  %v654_v46 = vmul.f32 0.5, %v1418_v45 }
 0xbf8   :  { %v655_v47 = vadd.f32 0.5, %v654_v46 }
 0xbfa   :  { %v656_v50 = vmul.f32 %v655_v47, %v570_v33  ;;  %v60_v33 = vrot.slane %v1528_v18, %v59_v32 }
 0xc68   :  { %v659_v48 = vpop.permute.xlu0 %658 }
 0xc69   :  { %v661_v49 = vmul.f32 %v659_v48, %v655_v47 }
 0xc6b   :  { %663 = vrot.lane.b32.xlu1 %v661_v49, %s1467_s24  ;;  %v47_v49 = vld [vmem:[#allocation2 + $0xa0] sm:$0xff] }
 0xcdd   :  { %v664_v51 = vpop.permute.xlu1 %663 }
 0xcde   :  { %v666_v52 = vadd.f32 %v664_v51, %v656_v50  ;;  %v48_v50 = vld [vmem:[#allocation2 + $0xb0] sm:$0xff]  ;;  %v49_v51 = vld [vmem:[#allocation2 + $0xc0] sm:$0xff] }
 0xce0   :  { %1419 = vtanh.f32 %v666_v52 }
 0xcea   :  { %v1420_v54 = vpop.eup %1419 }
 0xceb   :  { %669 = vrot.lane.b32.xlu0 %v1420_v54, %s1467_s24  ;;  %v1371_v54 = vpack.c.bf16 %v50_v53, %v49_v51 }
 0xd5d   :  { %v670_v55 = vpop.permute.xlu0 %669 }
 0xd5e   :  { %v672_v56 = vmul.f32 %v670_v55, %v655_v47 }
 0xd60   :  { %674 = vrot.lane.b32.xlu1 %v672_v56, %s1468_s27 }
 0xdd2   :  { %v675_v59 = vpop.permute.xlu1 %674 }
 0xdd3   :  { %1269 = vmatmul.mubr.msk.f32.vlgmr.msra.gmra.mrb[10].mxu0 %vm194_vm2, %v675_v59 }
 0xdd4   :  { %1357 = vmatpush3.bf16.msra.mxu0 %v1500_v9  ;;  %1279 = vmatprep.mubr.msk.f32.mxu0 %vm1466_vm0, %v1465_v1 }
 0xdd5   :  { %1358 = vmatprep.subr.bf16.mxu0 %v1464_v0 }
 0xdd8   :  { %1360 = vmatpush3.bf16.msra.mxu0 %v1506_v14  ;;  %v31_v14 = vld [vmem:[%s1663_s0 + $0x30] sm:$0xff] }
 0xdd9   :  { %1144 = vmatmul.mubr.msk.f32.gmra.mrb[12].mxu1 %vm63_vm1, %v31_v14 }
 0xdda   :  { %187 = vmatprep.mubr.f32.mxu1 %v1465_v1 }
 0xddd   :  { %1145 = vmatmul.mubr.msk.f32.gmra.mrb[14].mxu1 %vm63_vm1, %v32_v20 }
 0xdde   :  { %1290 = vmatprep.mubr.msk.f32.mxu1 %vm1466_vm0, %v1465_v1 }
 0xea6   :  { %v744_v61 = vpop.f32.mrb[10].mxu0 }
 0xea7   :  { %v748_v62 = vadd.f32 %v744_v61, %v180_v60  ;;  %v1270_v63 = vpop.f32.mrb[11].mxu0 }
 0xea9   :  { %1421 = vtanh.f32 %v748_v62 }
 0xeac   :  { %v184_v13 = vpop.f32.mrb[12].mxu1 }
 0xead   :  { %v186_v15 = vpop.f32.mrb[13].mxu1  ;;  %v185_v21 = vadd.f32 %v184_v13, %v1531_v19 }
 0xeb0   :  { %v189_v30 = vpop.f32.mrb[14].mxu1 }
 0xeb1   :  { %v191_v31 = vpop.f32.mrb[15].mxu1  ;;  %v190_v57 = vadd.f32 %v189_v30, %v1531_v19 }
 0xeb2   :  { %v192_v37 = vadd.f32 %v191_v31, %v60_v33 }
 0xeb3   :  { %v1422_v2 = vpop.eup %1421 }
 0xeb4   :  { %754 = vrot.lane.b32.xlu0 %v1422_v2, %s1467_s24  ;;  %v750_v3 = vmul.f32 0.5, %v1422_v2 }
 0xeb6   :  { %v751_v4 = vadd.f32 0.5, %v750_v3 }
 0xeb8   :  { %v752_v6 = vmul.f32 %v751_v4, %v666_v52  ;;  %v1368_v52 = vpack.c.bf16 %v48_v50, %v47_v49 }
 0xf26   :  { %v755_v5 = vpop.permute.xlu0 %754 }
 0xf27   :  { %v757_v9 = vmul.f32 %v755_v5, %v751_v4 }
 0xf29   :  { %759 = vrot.lane.b32.xlu1 %v757_v9, %s1467_s24 }
 0xf9b   :  { %v760_v7 = vpop.permute.xlu1 %759 }
 0xf9c   :  { %v762_v8 = vadd.f32 %v760_v7, %v752_v6  ;;  %v43_v6 = vld [vmem:[#allocation2 + $0x60] sm:$0xff]  ;;  %v44_v7 = vld [vmem:[#allocation2 + $0x70] sm:$0xff] }
 0xf9e   :  { %1423 = vtanh.f32 %v762_v8 }
 0xfa8   :  { %v1424_v10 = vpop.eup %1423 }
 0xfa9   :  { %765 = vrot.lane.b32.xlu0 %v1424_v10, %s1467_s24  ;;  %v1374_v10 = vpack.c.bf16 %v44_v7, %v43_v6 }
0x101b   :  { %v766_v11 = vpop.permute.xlu0 %765 }
0x101c   :  { %v768_v12 = vmul.f32 %v766_v11, %v751_v4  ;;  %v46_v11 = vld [vmem:[#allocation2 + $0x90] sm:$0xff] }
0x101e   :  { %770 = vrot.lane.b32.xlu1 %v768_v12, %s1468_s27 }
0x1090   :  { %v771_v17 = vpop.permute.xlu1 %770 }
0x1091   :  { %1280 = vmatmul.mubr.msk.f32.vlgmr.msra.gmra.mrb[12].mxu0 %vm194_vm2, %v771_v17 }
0x1164   :  { %v840_v22 = vpop.f32.mrb[12].mxu0 }
0x1165   :  { %v844_v23 = vadd.f32 %v840_v22, %v185_v21  ;;  %v1281_v24 = vpop.f32.mrb[13].mxu0  ;;  %v51_v21 = vld [vmem:[#allocation2 + $0xe1] ss:$0 sm:$0xff] }
0x1167   :  { %1425 = vtanh.f32 %v844_v23 }
0x1171   :  { %v1426_v25 = vpop.eup %1425 }
0x1172   :  { %850 = vrot.lane.b32.xlu0 %v1426_v25, %s1467_s24  ;;  %v846_v26 = vmul.f32 0.5, %v1426_v25 }
0x1174   :  { %v847_v27 = vadd.f32 0.5, %v846_v26 }
0x1176   :  { %v848_v34 = vmul.f32 %v847_v27, %v762_v8  ;;  %v45_v8 = vld [vmem:[#allocation2 + $0x80] sm:$0xff] }
0x1177   :  { %v1377_v13 = vpack.c.bf16 %v46_v11, %v45_v8 }
0x11e4   :  { %v851_v28 = vpop.permute.xlu0 %850 }
0x11e5   :  { %v853_v29 = vmul.f32 %v851_v28, %v847_v27 }
0x11e7   :  { %855 = vrot.lane.b32.xlu1 %v853_v29, %s1467_s24 }
0x1259   :  { %v856_v35 = vpop.permute.xlu1 %855 }
0x125a   :  { %v858_v36 = vadd.f32 %v856_v35, %v848_v34 }
0x125c   :  { %1427 = vtanh.f32 %v858_v36 }
0x125d   :  { %1429 = vtanh.f32 %v192_v37 }
0x1266   :  { %v1428_v38 = vpop.eup %1427 }
0x1267   :  { %861 = vrot.lane.b32.xlu0 %v1428_v38, %s1467_s24  ;;  %v1430_v39 = vpop.eup %1429 }
0x1268   :  { %v962_v40 = vmul.f32 0.5, %v1430_v39 }
0x126a   :  { %v963_v43 = vadd.f32 0.5, %v962_v40 }
0x126b   :  { %966 = vrot.lane.b32.xlu0 %v1430_v39, %s1467_s24 }
0x126c   :  { %v964_v45 = vmul.f32 0.0, %v963_v43 }
0x12d9   :  { %v862_v41 = vpop.permute.xlu0 %861 }
0x12da   :  { %v864_v42 = vmul.f32 %v862_v41, %v847_v27 }
0x12dc   :  { %866 = vrot.lane.b32.xlu1 %v864_v42, %s1468_s27 }
0x12dd   :  { %v967_v16 = vpop.permute.xlu0 %966 }
0x12de   :  { %v969_v18 = vmul.f32 %v967_v16, %v963_v43 }
0x12e0   :  { %971 = vrot.lane.b32.xlu0 %v969_v18, %s1467_s24 }
0x134e   :  { %v867_v44 = vpop.permute.xlu1 %866 }
0x134f   :  { %1291 = vmatmul.mubr.msk.f32.vlgmr.msra.gmra.mrb[16].mxu1 %vm194_vm2, %v867_v44 }
0x1350   :  { %1301 = vmatprep.mubr.msk.f32.mxu1 %vm1466_vm0, %v1465_v1  ;;  %1369 = vmatpush3.bf16.msra.mxu1 %v1368_v52 }
0x1351   :  { %1370 = vmatprep.subr.bf16.mxu1 %v1464_v0 }
0x1352   :  { %v972_v46 = vpop.permute.xlu0 %971 }
0x1353   :  { %v974_v47 = vadd.f32 %v972_v46, %v964_v45 }
0x1354   :  { %1372 = vmatpush3.bf16.msra.mxu1 %v1371_v54 }
0x1355   :  { %1431 = vtanh.f32 %v974_v47  ;;  %1373 = vmatprep.subr.bf16.mxu1 %v1464_v0 }
0x135f   :  { %v1432_v48 = vpop.eup %1431 }
0x1360   :  { %977 = vrot.lane.b32.xlu0 %v1432_v48, %s1467_s24 }
0x13d2   :  { %v978_v55 = vpop.permute.xlu0 %977 }
0x13d3   :  { %v980_v56 = vmul.f32 %v978_v55, %v963_v43 }
0x13d5   :  { %982 = vrot.lane.b32.xlu0 %v980_v56, %s1468_s27 }
0x1422   :  { %v936_v58 = vpop.f32.mrb[16].mxu1 }
0x1423   :  { %v940_v59 = vadd.f32 %v936_v58, %v190_v57  ;;  %v1292_v60 = vpop.f32.mrb[17].mxu1 }
0x1425   :  { %1433 = vtanh.f32 %v940_v59 }
0x142f   :  { %v1434_v61 = vpop.eup %1433 }
0x1430   :  { %946 = vrot.lane.b32.xlu1 %v1434_v61, %s1467_s24  ;;  %v942_v63 = vmul.f32 0.5, %v1434_v61 }
0x1432   :  { %v943_v2 = vadd.f32 0.5, %v942_v63 }
0x1434   :  { %v944_v19 = vmul.f32 %v943_v2, %v858_v36 }
0x1447   :  { %v983_v62 = vpop.permute.xlu0 %982 }
0x1448   :  { %1302 = vmatmul.mubr.msk.f32.vlgmr.msra.gmra.mrb[18].mxu1 %vm194_vm2, %v983_v62 }
0x1449   :  { %1312 = vmatprep.mubr.msk.f32.mxu1 %vm1466_vm0, %v1465_v1  ;;  %1375 = vmatpush3.bf16.msra.mxu1 %v1374_v10 }
0x144a   :  { %1376 = vmatprep.subr.bf16.mxu1 %v1464_v0 }
0x144d   :  { %1378 = vmatpush3.bf16.msra.mxu1 %v1377_v13 }
0x14a2   :  { %v947_v3 = vpop.permute.xlu1 %946 }
0x14a3   :  { %v949_v4 = vmul.f32 %v947_v3, %v943_v2 }
0x14a5   :  { %951 = vrot.lane.b32.xlu1 %v949_v4, %s1467_s24 }
0x1517   :  { %v952_v5 = vpop.permute.xlu1 %951 }
0x1518   :  { %v954_v9 = vadd.f32 %v952_v5, %v944_v19 }
0x151a   :  { %1435 = vtanh.f32 %v954_v9 }
0x151b   :  { %v1052_v14 = vpop.f32.mrb[18].mxu1 }
0x151c   :  { %v1303_v12 = vpop.f32.mrb[19].mxu1 }
0x1524   :  { %v1436_v1 = vpop.eup %1435 }
0x1525   :  { %957 = vrot.lane.b32.xlu1 %v1436_v1, %s1467_s24 }
0x1597   :  { %v958_v15 = vpop.permute.xlu1 %957 }
0x1598   :  { %v960_v17 = vmul.f32 %v958_v15, %v943_v2 }
0x159a   :  { %1057 = vrot.lane.b32.xlu1 %v960_v17, %s1468_s27 }
0x160c   :  { %v1058_v20 = vpop.permute.xlu1 %1057 }
0x160d   :  { %1313 = vmatmul.mubr.msk.f32.vlgmr.msra.gmra.mrb[20].mxu1 %vm194_vm2, %v1058_v20 }
0x16e0   :  { %v1127_v22 = vpop.f32.mrb[20].mxu1 }
0x16e1   :  { %v1128_v23 = vadd.f32 %v1127_v22, %v1052_v14  ;;  %v1314_v24 = vpop.f32.mrb[21].mxu1 }
0x16e3   :  { %v1131_v25 = vadd.f32 %v1128_v23, %v51_v21 }
0x16e5   :  { %1132 = vst [vmem:[%s1665_s2] sm:$0xff] %v1131_v25 }
0x16e6   :  { %1137 = vsyncpa [#allocation3], 1 }

</bundles_post_ra>
